<compile_context>
chip_gen: v6e
topology: v6e:2x2x1
jax: 0.10.0
libtpu: 0.0.40
codegen_flags: <defaults>
</compile_context>

<pallas_src>
import jax
import jax.numpy as jnp
from jax.experimental import pallas as pl
from jax.experimental.pallas import tpu as pltpu


def _is_arraylike(v):
    """True if `v` can be treated as a numeric JAX value."""
    return isinstance(v, (jax.Array, int, float, bool, complex)) or hasattr(
        v, "__array__"
    ) or hasattr(v, "dtype")


# ----------------------------------------------------------------------------
# Production path: Always(val)(*args, **kwargs) == val.
# No pallas_call, no launch overhead — the op is free in the compiled graph.
# ----------------------------------------------------------------------------
def always(val, *args, **kwargs):
    del args, kwargs  # forward(*args, **kwargs) ignores everything
    if not _is_arraylike(val):
        # Parity with PyTorch: Always(None) (or any non-numeric object)
        # returns the stored object untouched.
        return val
    # NOTE: a bare Python scalar becomes a weak-typed constant; callers that
    # care about exact dtype should store a dtype-carrying value (as __main__
    # does with jnp.float32).
    return jnp.asarray(val)


# ----------------------------------------------------------------------------
# Parity path (test-only): dependency-free Pallas kernel that passes the
# scalar constant through one SMEM word. Kept solely to validate the Pallas
# plumbing; never route hot-path code through this.
# ----------------------------------------------------------------------------
def _always_kernel(val_ref, o_ref):
    # Single SMEM-word pass-through.
    o_ref[0] = val_ref[0]


def always_pallas(val, *args, interpret=False, **kwargs):
    """Pallas equivalent of Always(val)(*args, **kwargs).

    The ignored forward args are intentionally NOT handed to pallas_call so
    the custom call has no data dependency on them. Scalar constants go
    through a one-word SMEM kernel; tensor constants are returned directly
    (a Pallas copy would be pure overhead).
    """
    del args, kwargs  # ignored, exactly like the PyTorch forward

    if not _is_arraylike(val):
        return val  # e.g. Always(None)

    val_arr = jnp.asarray(val)

    if val_arr.ndim > 0:
        # Tensor-valued constant: returning the stored device array is free.
        # TODO(synk): if a Pallas copy is ever forced here, make the output
        # lane-dense (last dim multiple of 128, second-to-last multiple of
        # 8/16), tile as large as VMEM allows (budget against 64 MiB on v7x,
        # double-buffering counted), and add a leading "parallel" grid axis
        # so both v7x TensorCores write halves of the output.
        return val_arr

    flat = val_arr.reshape((1,))  # keep 1-D: (1,1) SMEM would pad to 8x128 words

    out = pl.pallas_call(
        _always_kernel,
        out_shape=jax.ShapeDtypeStruct((1,), flat.dtype),
        in_specs=[pl.BlockSpec(memory_space=pltpu.SMEM)],  # the stored constant
        out_specs=pl.BlockSpec(memory_space=pltpu.SMEM),
        interpret=interpret,
    )(flat)

    # Always returns the value itself (a scalar here), not a broadcast tensor.
    return out.reshape(())


if __name__ == "__main__":
    key = jax.random.PRNGKey(0)

    # The constant the module was constructed with (deterministic, dtype-carrying).
    val = jnp.float32(3.5)

    # Example forward arguments (all ignored by Always). NCHW layout.
    x = jax.random.normal(key, (2, 4, 16, 16), dtype=jnp.float32)

    # --- Production path: no kernel at all (this is what real code uses). ---
    fast = jax.block_until_ready(always(val, x, mask=None))

    # --- Parity path, compiled Mosaic kernel (run once to prove TPU-clean). ---
    result = jax.block_until_ready(always_pallas(val, x))

    # --- Parity path, interpret mode (how the test suite should exercise it:
    #     validates plumbing with no Mosaic compile cost). ---
    result_interp = jax.block_until_ready(always_pallas(val, x, interpret=True))

    # --- Tensor-valued and None-valued constants (no kernel in either case). ---
    tconst = jax.random.normal(jax.random.PRNGKey(1), (4, 8), dtype=jnp.float32)
    tensor_out = jax.block_until_ready(always_pallas(tconst, x))
    none_out = always(None, x)

    assert result.shape == () and result.dtype == jnp.float32
    assert bool(jnp.allclose(result, val)), (result, val)
    assert bool(jnp.allclose(result_interp, val)), (result_interp, val)
    assert bool(jnp.allclose(fast, val)), (fast, val)
    assert bool(jnp.allclose(tensor_out, tconst))
    assert none_out is None

    print("KERNEL_OK")
</pallas_src>

<mosaic_0001>
module attributes {stable_mosaic.version = 11 : i64} {
  func.func @_always_kernel(%arg0: memref<1xf32, #tpu.memory_space<smem>>, %arg1: memref<1xf32, #tpu.memory_space<smem>>) attributes {dimension_semantics = [], scalar_prefetch = 0 : i64, scratch_operands = 0 : i64, tpu.core_type = #tpu.core_type<tc>} {
    %c0 = arith.constant 0 : index
    %0 = memref.load %arg0[%c0] : memref<1xf32, #tpu.memory_space<smem>>
    %c0_0 = arith.constant 0 : index
    %1 = memref.load %arg1[%c0_0] : memref<1xf32, #tpu.memory_space<smem>>
    memref.store %0, %arg1[%c0_0] : memref<1xf32, #tpu.memory_space<smem>>
    return
  }
}

</mosaic_0001>

<bundles_post_ra>
// kernel: tpu_custom_call.1
= control target key start
LH: loop header
LB: loop body
LE: loop exit
PB: predicated region body
PF: predicated region fallthrough
CT: control target
= control target key end

     0   :  { %7 = vsyncpa [#allocation4], 0  ;;  %s37_s8 = smov [#allocation3]   ;;  %s54_s0 = inlined_call_operand.<no memory space> [shape: f32[1], index: 0, kind: input, shape index: {}]   ;;  %s55_s1 = inlined_call_operand.hbm [shape: f32[1], index: 1, kind: output, shape index: {}]  }
   0x1   :  { %12 = sst [smem:[#allocation3]] %s54_s0 }
   0x2   :  { %20 = dma.smem_to_hbm %s37_s8, 16, %s55_s1, [#allocation4]  }
   0x3   :  { %35 = dma.done.wait [#allocation4], 16  }
   0x4   :  { %36 = vsyncadd [#allocation4], 4294967280 }
   0x5   :  { %24 = sfence }
   0x6   :  { %25 = vsyncpa [#allocation4], 1 }

</bundles_post_ra>
